<compile_context>
chip_gen: v6e
topology: v6e:2x2x1
jax: 0.10.0
libtpu: 0.0.40
codegen_flags: <defaults>
</compile_context>

<pallas_src>
import jax
import jax.numpy as jnp
from jax.experimental import pallas as pl
from jax.experimental.pallas import tpu as pltpu

EPS = 1e-5


# --------------------------------------------------------------------------
# Kernel
# --------------------------------------------------------------------------
def _make_kernel(hw_total, thw, acc_lanes, needs_mask):
    """Spatial-sum reduction + folded (BN+pool+Linear) classifier.

    x_ref  : (tb, C, thw)   native dtype  -- one spatial slab of the activation
    w_ref  : (C, n_pad)     f32           -- BN/pool-folded classifier weight
    b_ref  : (1, n_pad)     f32           -- folded bias
    out_ref: (tb, n_pad)    f32           -- logits (class dim padded to 128)
    acc_ref: (tb, C, acc_lanes) f32       -- lane-dense running partial sums
    """
    nchunks = thw // acc_lanes

    def kernel(x_ref, w_ref, b_ref, out_ref, acc_ref):
        hw_step = pl.program_id(1)
        last = pl.num_programs(1) - 1

        @pl.when(hw_step == 0)
        def _init():
            acc_ref[...] = jnp.zeros_like(acc_ref)

        def accumulate(mask_tail):
            # Lane-wise tree add of 128-lane chunks; no per-step XLU reduce.
            def load_chunk(c):
                v = x_ref[:, :, pl.ds(c * acc_lanes, acc_lanes)].astype(jnp.float32)
                if mask_tail:
                    # Zero columns past HW (garbage lanes of the partial tile).
                    col = (hw_step * thw + c * acc_lanes
                           + jax.lax.broadcasted_iota(jnp.int32, v.shape, 2))
                    v = jnp.where(col < hw_total, v, 0.0)
                return v

            partial = load_chunk(0)
            for c in range(1, nchunks):
                partial = partial + load_chunk(c)
            acc_ref[...] += partial

        if needs_mask:
            # Only the last HW tile is partial; keep the steady-state path
            # mask-free (pure vld + vadd).
            @pl.when(hw_step == last)
            def _tail():
                accumulate(True)

            @pl.when(hw_step != last)
            def _full():
                accumulate(False)
        else:
            accumulate(False)

        @pl.when(hw_step == last)
        def _finalize():
            # Single cross-lane reduce + tiny MXU matmul, once per batch tile.
            pooled = jnp.sum(acc_ref[...], axis=-1)                 # (tb, C)
            logits = jnp.dot(pooled, w_ref[...],
                             preferred_element_type=jnp.float32) + b_ref[...]
            out_ref[...] = logits.astype(out_ref.dtype)

    return kernel


# --------------------------------------------------------------------------
# Tiling / VMEM budgeting
# --------------------------------------------------------------------------
def _round_up(x, m):
    return ((x + m - 1) // m) * m


def _vmem_capacity_bytes():
    try:
        cap = int(pltpu.get_tpu_info().vmem_capacity_bytes)
        if cap > 0:
            return cap
    except Exception:
        pass
    return 64 << 20  # conservative fallback (v7x per-core VMEM)


def _pick_tiles(B, C, HW, n_pad, itemsize, tile_b=None, tile_hw=None):
    cap = _vmem_capacity_bytes()
    # 64 MiB scoped on 128 MiB parts (v5e/v6e), 32 MiB on v7x.
    vmem_limit = min(cap // 2, 64 << 20)
    budget = int(vmem_limit * 0.55)

    def footprint(tb_, thw_):
        return (2 * tb_ * C * thw_ * itemsize            # x, double-buffered
                + tb_ * C * min(thw_, 128) * 4           # lane-dense accumulator
                + 2 * C * n_pad * 4 + 2 * n_pad * 4      # folded weight / bias
                + 2 * tb_ * n_pad * 4)                   # logits block

    # Batch tile: multiple of 8 (output-block legality); default 8 so the
    # 'parallel' batch axis has multiple steps for v7x megacore.
    tb = tile_b if tile_b is not None else (8 if B % 8 == 0 else B)

    if tile_hw is not None:
        thw = tile_hw
    else:
        # HW tile: multiple of 128 lanes, never larger than HW, contiguous
        # DMA rows >= 512 B; grow to fill the VMEM budget.
        thw_cap = (HW // 128) * 128 if HW >= 128 else HW
        thw = min(thw_cap, max(128, _round_up(max(1, 512 // itemsize), 128)))
        while thw + 128 <= thw_cap and footprint(tb, thw + 128) <= budget:
            thw += 128
        # HW axis exhausted -> spend leftover budget on a bigger batch tile,
        # but never collapse the parallel axis to a single step.
        if tile_b is None and thw >= thw_cap and tb < B:
            best = tb
            for cand in range(tb, B + 1):
                if (B % cand == 0 and cand % 8 == 0 and B // cand >= 2
                        and footprint(cand, thw) <= budget):
                    best = cand
            tb = best

    need = footprint(tb, thw)
    if need > int(vmem_limit * 0.55):
        vmem_limit = min(int(cap * 0.9),
                         _round_up(int(need / 0.55) + (1 << 20), 1 << 20))
    return tb, thw, vmem_limit


# --------------------------------------------------------------------------
# Wrapper
# --------------------------------------------------------------------------
def early_exit_block(x_nchw, gamma, beta, rmean, rvar, weight, bias,
                     *, tile_b=None, tile_hw=None):
    """x_nchw: (B, C, H, W). weight: (n_classes, C) (PyTorch Linear layout).
    Returns logits (B, n_classes) float32."""
    B, C, H, W = x_nchw.shape
    HW = H * W
    n_classes = weight.shape[0]
    n_pad = _round_up(n_classes, 128)   # lane-dense classifier / output block

    # ---- Fold eval-mode BatchNorm2d + AdaptiveAvgPool2d(1) into the Linear --
    #   BN:     y_c = scale_c * x_c + shift_c
    #   pool:   p_c = sum_hw(y_c) / HW
    #   linear: logits = p @ W^T + b
    #         = sum_hw(x) @ (scale[:,None] * W^T / HW) + (shift @ W^T + b)
    gamma = gamma.astype(jnp.float32)
    beta = beta.astype(jnp.float32)
    rmean = rmean.astype(jnp.float32)
    rvar = rvar.astype(jnp.float32)
    w_f32 = weight.astype(jnp.float32)                  # (n_classes, C)
    b_f32 = bias.astype(jnp.float32)                    # (n_classes,)

    scale = gamma * jax.lax.rsqrt(rvar + EPS)           # (C,)
    shift = beta - rmean * scale                        # (C,)
    w_fold = (scale[:, None] * w_f32.T) / float(HW)     # (C, n_classes)
    b_fold = (shift @ w_f32.T + b_f32)[None, :]         # (1, n_classes)
    if n_pad != n_classes:
        w_fold = jnp.pad(w_fold, ((0, 0), (0, n_pad - n_classes)))
        b_fold = jnp.pad(b_fold, ((0, 0), (0, n_pad - n_classes)))

    # x stays in its native dtype (no wrapper-side pass over HBM); reshape is free.
    x = x_nchw.reshape(B, C, HW)
    itemsize = jnp.dtype(x.dtype).itemsize

    tb, thw, vmem_limit = _pick_tiles(B, C, HW, n_pad, itemsize,
                                      tile_b=tile_b, tile_hw=tile_hw)
    assert B % tb == 0 and (tb % 8 == 0 or tb == B), "illegal batch tile"
    assert thw <= HW and (thw % 128 == 0 or thw == HW), "illegal HW tile"

    n_hw = (HW + thw - 1) // thw
    needs_mask = (HW % thw) != 0
    acc_lanes = 128 if thw % 128 == 0 else thw
    grid = (B // tb, n_hw)

    kernel = _make_kernel(HW, thw, acc_lanes, needs_mask)

    cost = pl.CostEstimate(
        flops=B * C * HW + 2 * B * C * n_pad,
        transcendentals=0,
        bytes_accessed=(x.size * itemsize + w_fold.size * 4 + b_fold.size * 4
                        + B * n_pad * 4),
    )

    out_padded = pl.pallas_call(
        kernel,
        out_shape=jax.ShapeDtypeStruct((B, n_pad), jnp.float32),
        grid_spec=pltpu.PrefetchScalarGridSpec(
            num_scalar_prefetch=0,
            grid=grid,
            in_specs=[
                pl.BlockSpec((tb, C, thw), lambda b, h: (b, 0, h)),
                pl.BlockSpec((C, n_pad), lambda b, h: (0, 0)),
                pl.BlockSpec((1, n_pad), lambda b, h: (0, 0)),
            ],
            out_specs=pl.BlockSpec((tb, n_pad), lambda b, h: (b, 0)),
            scratch_shapes=[pltpu.VMEM((tb, C, acc_lanes), jnp.float32)],
        ),
        compiler_params=pltpu.CompilerParams(
            dimension_semantics=("parallel", "arbitrary"),
            vmem_limit_bytes=int(vmem_limit)),
        cost_estimate=cost,
    )(x, w_fold, b_fold)

    return out_padded[:, :n_classes]


# --------------------------------------------------------------------------
# Pure-JAX reference (eval-mode BN -> global avg pool -> Linear)
# --------------------------------------------------------------------------
def reference(x_nchw, gamma, beta, rmean, rvar, weight, bias):
    xn = (x_nchw - rmean[None, :, None, None]) / jnp.sqrt(
        rvar[None, :, None, None] + EPS)
    xn = xn * gamma[None, :, None, None] + beta[None, :, None, None]
    pooled = jnp.mean(xn, axis=(2, 3))                  # (B, C)
    return pooled @ weight.T + bias[None, :]


if __name__ == "__main__":
    # Small shapes consistent with the module's forward.
    B, C, H, W = 2, 4, 16, 16
    N_CLASSES = 10

    key = jax.random.PRNGKey(0)
    kx, kx2, kg, kb, km, kv, kw, kbias = jax.random.split(key, 8)

    gamma = jax.random.uniform(kg, (C,), minval=0.5, maxval=1.5, dtype=jnp.float32)
    beta = jax.random.normal(kb, (C,), dtype=jnp.float32) * 0.1
    rmean = jax.random.normal(km, (C,), dtype=jnp.float32) * 0.1
    rvar = jax.random.uniform(kv, (C,), minval=0.5, maxval=1.5, dtype=jnp.float32)
    weight = jax.random.normal(kw, (N_CLASSES, C), dtype=jnp.float32) * 0.1
    bias = jax.random.normal(kbias, (N_CLASSES,), dtype=jnp.float32) * 0.1

    # Case 1: HW = 256 with tile_hw=128 -> multi-step (unmasked) HW reduction.
    x = jax.random.normal(kx, (B, C, H, W), dtype=jnp.float32)
    out = jax.block_until_ready(
        early_exit_block(x, gamma, beta, rmean, rvar, weight, bias, tile_hw=128))
    ref = reference(x, gamma, beta, rmean, rvar, weight, bias)
    assert out.shape == (B, N_CLASSES)
    assert jnp.allclose(out, ref, atol=1e-4, rtol=1e-4), "mismatch (hw tile 128)"

    # Case 2: auto-picked tiles (single full HW tile here).
    out2 = jax.block_until_ready(
        early_exit_block(x, gamma, beta, rmean, rvar, weight, bias))
    assert jnp.allclose(out2, ref, atol=1e-4, rtol=1e-4), "mismatch (auto tiles)"

    # Case 3: HW = 225 (not a multiple of 128) -> exercises the masked tail tile.
    x2 = jax.random.normal(kx2, (B, C, 15, 15), dtype=jnp.float32)
    out3 = jax.block_until_ready(
        early_exit_block(x2, gamma, beta, rmean, rvar, weight, bias, tile_hw=128))
    ref3 = reference(x2, gamma, beta, rmean, rvar, weight, bias)
    assert jnp.allclose(out3, ref3, atol=1e-4, rtol=1e-4), "mismatch (masked tail)"

    # TODO(synk): BatchNorm running-stat *updates* (train mode) and the unused
    # softmax_layer are not modeled; kernel implements eval-mode BN + Linear as
    # used during calibration/inference.
    print("KERNEL_OK")
</pallas_src>

<mosaic_0001>
module attributes {stable_mosaic.version = 11 : i64} {
  func.func @kernel(%arg0: i32, %arg1: i32, %arg2: memref<2x4x128xf32, #tpu.memory_space<vmem>>, %arg3: memref<4x128xf32, #tpu.memory_space<vmem>>, %arg4: memref<1x128xf32, #tpu.memory_space<vmem>>, %arg5: memref<2x128xf32, #tpu.memory_space<vmem>>, %arg6: memref<2x4x128xf32, #tpu.memory_space<vmem>>) attributes {dimension_semantics = [#tpu.dimension_semantics<parallel>, #tpu.dimension_semantics<arbitrary>], iteration_bounds = array<i64: 1, 2>, scalar_prefetch = 0 : i64, scratch_operands = 1 : i64, tpu.core_type = #tpu.core_type<tc>, window_params = [{transform_indices = @transform_0, window_bounds = array<i64: 2, 4, 128>}, {pipeline_mode = #tpu.pipeline_mode<synchronous>, transform_indices = @transform_1, window_bounds = array<i64: 4, 128>}, {pipeline_mode = #tpu.pipeline_mode<synchronous>, transform_indices = @transform_2, window_bounds = array<i64: 1, 128>}, {transform_indices = @transform_3, window_bounds = array<i64: 2, 128>}]} {
    %c0_i32 = arith.constant 0 : i32
    %0 = arith.cmpi eq, %arg1, %c0_i32 : i32
    %1 = arith.extui %0 : i1 to i32
    %c0_i32_0 = arith.constant 0 : i32
    %2 = arith.cmpi ne, %1, %c0_i32_0 : i32
    scf.if %2 {
      %cst = arith.constant 0.000000e+00 : f32
      %10 = vector.broadcast %cst : f32 to vector<2x4x128xf32>
      %c0_10 = arith.constant 0 : index
      %c0_11 = arith.constant 0 : index
      %c0_12 = arith.constant 0 : index
      %11 = vector.load %arg6[%c0_10, %c0_11, %c0_12] : memref<2x4x128xf32, #tpu.memory_space<vmem>>, vector<2x4x128xf32>
      tpu.vector_store %arg6[%c0_10, %c0_11, %c0_12], %10 {strides = array<i32>} : memref<2x4x128xf32, #tpu.memory_space<vmem>>, vector<2x4x128xf32>,
    } else {
    }
    %c0 = arith.constant 0 : index
    %c0_1 = arith.constant 0 : index
    %c0_2 = arith.constant 0 : index
    %3 = vector.load %arg2[%c0, %c0_1, %c0_2] : memref<2x4x128xf32, #tpu.memory_space<vmem>>, vector<2x4x128xf32>
    %c0_3 = arith.constant 0 : index
    %c0_4 = arith.constant 0 : index
    %c0_5 = arith.constant 0 : index
    %4 = vector.load %arg6[%c0_3, %c0_4, %c0_5] : memref<2x4x128xf32, #tpu.memory_space<vmem>>, vector<2x4x128xf32>
    %5 = arith.addf %4, %3 : vector<2x4x128xf32>
    %c0_6 = arith.constant 0 : index
    %c0_7 = arith.constant 0 : index
    %c0_8 = arith.constant 0 : index
    %6 = vector.load %arg6[%c0_6, %c0_7, %c0_8] : memref<2x4x128xf32, #tpu.memory_space<vmem>>, vector<2x4x128xf32>
    tpu.vector_store %arg6[%c0_6, %c0_7, %c0_8], %5 {strides = array<i32>} : memref<2x4x128xf32, #tpu.memory_space<vmem>>, vector<2x4x128xf32>,
    %c1_i32 = arith.constant 1 : i32
    %7 = arith.cmpi eq, %arg1, %c1_i32 : i32
    %8 = arith.extui %7 : i1 to i32
    %c0_i32_9 = arith.constant 0 : i32
    %9 = arith.cmpi ne, %8, %c0_i32_9 : i32
    scf.if %9 {
      %c0_10 = arith.constant 0 : index
      %c0_11 = arith.constant 0 : index
      %c0_12 = arith.constant 0 : index
      %10 = vector.load %arg6[%c0_10, %c0_11, %c0_12] : memref<2x4x128xf32, #tpu.memory_space<vmem>>, vector<2x4x128xf32>
      %cst = arith.constant dense<0.000000e+00> : vector<2x4xf32>
      %11 = vector.multi_reduction <add>, %10, %cst [2] : vector<2x4x128xf32> to vector<2x4xf32>
      %c0_13 = arith.constant 0 : index
      %c0_14 = arith.constant 0 : index
      %12 = vector.load %arg3[%c0_13, %c0_14] : memref<4x128xf32, #tpu.memory_space<vmem>>, vector<4x128xf32>
      %cst_15 = arith.constant dense<0.000000e+00> : vector<2x128xf32>
      %13 = tpu.matmul %11, %12, %cst_15 {dimension_numbers = #tpu.dot_dimension_numbers<[1], [0], [0], [1], [0, 0, 1, 1], [], []>} : vector<2x4xf32>, vector<4x128xf32>, vector<2x128xf32> -> vector<2x128xf32>
      %c0_16 = arith.constant 0 : index
      %c0_17 = arith.constant 0 : index
      %14 = vector.load %arg4[%c0_16, %c0_17] : memref<1x128xf32, #tpu.memory_space<vmem>>, vector<1x128xf32>
      %15 = vector.broadcast %14 : vector<1x128xf32> to vector<2x128xf32>
      %16 = arith.addf %13, %15 : vector<2x128xf32>
      %c0_18 = arith.constant 0 : index
      %c0_19 = arith.constant 0 : index
      %17 = vector.load %arg5[%c0_18, %c0_19] : memref<2x128xf32, #tpu.memory_space<vmem>>, vector<2x128xf32>
      tpu.vector_store %arg5[%c0_18, %c0_19], %16 {strides = array<i32>} : memref<2x128xf32, #tpu.memory_space<vmem>>, vector<2x128xf32>,
    } else {
    }
    return
  }
  func.func @transform_0(%arg0: i32, %arg1: i32) -> (i32, i32, i32) {
    %c0_i32 = arith.constant 0 : i32
    %c0_i32_0 = arith.constant 0 : i32
    return %arg0, %c0_i32, %arg1 : i32, i32, i32
  }
  func.func @transform_1(%arg0: i32, %arg1: i32) -> (i32, i32) {
    %c0_i32 = arith.constant 0 : i32
    %c0_i32_0 = arith.constant 0 : i32
    %c0_i32_1 = arith.constant 0 : i32
    return %c0_i32, %c0_i32_0 : i32, i32
  }
  func.func @transform_2(%arg0: i32, %arg1: i32) -> (i32, i32) {
    %c0_i32 = arith.constant 0 : i32
    %c0_i32_0 = arith.constant 0 : i32
    %c0_i32_1 = arith.constant 0 : i32
    return %c0_i32, %c0_i32_0 : i32, i32
  }
  func.func @transform_3(%arg0: i32, %arg1: i32) -> (i32, i32) {
    %c0_i32 = arith.constant 0 : i32
    %c0_i32_0 = arith.constant 0 : i32
    return %arg0, %c0_i32 : i32, i32
  }
}

</mosaic_0001>

<bundles_post_ra>
// kernel: tpu_custom_call.1
= control target key start
LH: loop header
LB: loop body
LE: loop exit
PB: predicated region body
PF: predicated region fallthrough
CT: control target
= control target key end

     0   :  { %8 = vsyncpa [#allocation4], 0  ;;  %s825_s0 = inlined_call_operand.hbm [shape: f32[2,4,256], index: 0, kind: input, shape index: {}]   ;;  %s826_s1 = inlined_call_operand.hbm [shape: f32[4,128], index: 1, kind: input, shape index: {}]   ;;  %s827_s2 = inlined_call_operand.vmem [shape: f32[1,128], index: 2, kind: input, shape index: {}]   ;;  %s828_s3 = inlined_call_operand.hbm [shape: f32[2,128], index: 3, kind: output, shape index: {}]  }
   0x1   :  { %10 = vsyncpa [#allocation4 + $0x1], 0 }
   0x2   :  { %11 = vsyncpa [#allocation7], 0 }
   0x3   :  { %12 = vsyncpa [#allocation5], 0  ;;  %s691_s12 = smov 0   ;;  %s693_s13 = smov 0  }
   0x4   :  { %s695_s14 = smov 0   ;;  %s697_s15 = smov 0  }
   0x5   :  { %s699_s16 = smov 0   ;;  %s701_s17 = smov 0  }
   0x6 LB: > { %s420_s18 = sadd.s32 4294967295, %s660_s17   ;;  %s39_s19 = sadd.s32 1, %s648_s14  ;;  %s660_s17 = sphi %s701_s17, %s18_s17   ;;  %s656_s16 = sphi %s699_s16, %s843_s16   ;;  %s652_s15 = sphi %s697_s15, %s842_s15   ;;  %s648_s14 = sphi %s695_s14, %s841_s14   ;;  %s644_s13 = sphi %s693_s13, %s840_s13   ;;  %s640_s12 = sphi %s691_s12, %s839_s12  }
   0x7   : > { %p46_p0 = scmp.ne.s32.totalorder %s648_s14, %s644_s13  ;;  %p47_p1 = scmp.eq.s32.totalorder %s660_s17, 0 }
   0x8   : > { %p52_p2 = scmp.ne.s32.totalorder %s644_s13, %s640_s12  ;;  %p727_p3 = scmp.eq.s32.totalorder %s420_s18, 0 }
   0x9   : > { %p48_p4 = por %p47_p1, %p46_p0  ;;  %p421_p5 = scmp.ge.s32.totalorder %s660_s17, 1 }
   0xa   : > { %p734_p6 = por %p727_p3, %p52_p2  ;;  %p131_p7 = scmp.lt.s32.totalorder %s660_s17, 3 }
   0xb   : > { %s662_s23 = smov [#allocation6]   ;;  %p464_p10 = scmp.lt.s32.totalorder %s660_s17, 2 }
   0xc   : > { %s832_s21 = scalar_select %p734_p6, 1, 0 }
   0xd   : > { %p739_p8 = pnand %p421_p5, %p131_p7  ;;  %s144_s24 = sshll.u32 %s662_s23, 4  ;;  %s145_s24 = int_to_ptr.vmem [resolvable:$true] %s144_s24 }
   0xe   : > { %s158_s25 = sand.u32 1, %s648_s14   ;;  %p749_p12 = pnand %p464_p10, %p48_p4 }
   0xf   : > { %s833_s22 = scalar_select %p739_p8, 1, 0 }
  0x10   : > { %p455_p9 = pneg %p739_p8  ;;  %s535_s27 = scalar_lea.vmem %s145_s24, 64 }
  0x11   : > { %p536_p0 = scmp.ne.s32.totalorder %s145_s24, %s535_s27  ;;  %p543_p5 = scmp.lt.s32.totalorder %s145_s24, %s145_s24 }
  0x12   : > { %p456_p11 = pnand %p455_p9, %p727_p3  ;;  %p544_p7 = scmp.lt.s32.totalorder %s535_s27, %s535_s27 }
  0x14   : > { %p526_p13 = pneg %p456_p11  ;;  %p545_p6 = por %p544_p7, %p543_p5 }
  0x16   : > { %p538_p1 = pnand %p536_p0, %p526_p13 }
  0x18   : > { %p539_p2 = pneg %p538_p1 }
  0x1a   : > { %p546_p8 = pnand %p545_p6, %p539_p2 }
  0x1c   : > { %549 = shalt.err (!%p546_p8)
}
  0x1d   : > { %458 = dma.hbm_to_vmem [thread:$0]  (!%p456_p11), %s826_s1, 64, %s145_s24, [#allocation7]  }
  0x1e   : > { %s27_s30 = sadd.s32 1, %s656_s16  ;;  %s424_s4 = sshll.u32 %s158_s25, 3 }
  0x1f   : > { %p28_p4 = scmp.ge.s32.totalorder %s27_s30, 2  ;;  %s425_s5 = sshll.u32 %s656_s16, 6 }
  0x20   : > { %s162_s6 = scalar_lea.vmem [#allocation3], %s424_s4  ;;  %s170_s10 = scalar_lea.hbm %s825_s0, %s425_s5 }
  0x21   : > { %s171_s7 = sshll.u32 %s162_s6, 4  ;;  %s845_s30 = smov (%p28_p4, %s27_s30), 0  ;;  %s172_s7 = int_to_ptr.vmem [resolvable:$true] %s171_s7 }
  0x22   : > { %s35_s11 = ssub.s32 %s656_s16, %s845_s30  ;;  %s159_s23 = scalar_lea.sflag [#allocation4], %s158_s25 }
  0x23   : > { %p37_p6 = scmp.eq.s32.totalorder %s35_s11, 0  ;;  %p552_p8 = pneg %p749_p12 }
  0x24   : > { %s563_s24 = scalar_lea.vmem %s172_s7, 128  ;;  %s663_s27 = smov [#allocation3]  }
  0x25   : > { %s768_s12 = scalar_select %p37_p6, %s648_s14, %s39_s19  }
  0x26   : > { %p564_p9 = scmp.ne.s32.totalorder %s172_s7, %s563_s24  ;;  %s568_s28 = sshll.u32 %s663_s27, 4  ;;  %s569_s28 = int_to_ptr.vmem [resolvable:$false] %s568_s28 }
  0x27   : > { %s570_s29 = scalar_lea.vmem %s569_s28, 256  ;;  %p571_p13 = scmp.lt.s32.totalorder %s172_s7, %s569_s28 }
  0x28   : > { %p566_p10 = pnand %p564_p9, %p552_p8  ;;  %p572_p0 = scmp.lt.s32.totalorder %s570_s29, %s563_s24 }
  0x2a   : > { %p567_p11 = pneg %p566_p10  ;;  %p573_p1 = por %p572_p0, %p571_p13 }
  0x2c   : > { %p574_p2 = pnand %p573_p1, %p567_p11 }
  0x2e   : > { %577 = shalt.err (!%p574_p2)
}
  0x2f   : > { %s664_s4 = smov 128   ;;  %s665_s19 = smov 64  }
  0x30   : > { %s666_s5 = smov 4   ;;  %p835_p5 = scmp.ne.s32.totalorder %s833_s22, 0 }
  0x31   : > { %462 = dma.hbm_to_vmem [thread:$0]  (!%p749_p12), %s170_s10, 128, %s172_s7, %s159_s23, %s664_s4, %s665_s19, %s666_s5  }
  0x32   : > { %183 = sbr.rel (%p835_p5) target bundleno = 441 (0x1b9), region = 32  ;;  %s185_s25 = sand.u32 (!%p835_p5), 1, %s644_s13  }
  0x33   : > { %s427_s6 = sshll.u32 (!%p835_p5), %s185_s25, 3  ;;  %s186_s8 = scalar_lea.sflag (!%p835_p5), [#allocation4], %s185_s25 }
  0x34   : > { %s189_s9 = scalar_lea.vmem (!%p835_p5), [#allocation3], %s427_s6  ;;  %p836_p7 = scmp.ne.s32.totalorder (!%p835_p5), %s832_s21, 0 }
  0x37   : > { %627 = dma.done.wait (%p836_p7), %s186_s8, 128  }
  0x38   : > { %629 = vsyncadd (%p836_p7), %s186_s8, 4294967168 }
  0x39   : > { %631 = dma.done.wait (%p727_p3), [#allocation7], 64  }
  0x3a   : > { %633 = vsyncadd (%p727_p3), [#allocation7], 4294967232  ;;  %p429_p12 = scmp.ne.s32.totalorder %s652_s15, 0 }
  0x3c   : > { %215 = sbr.rel (%p429_p12) target bundleno = 67 (0x43), region = 44 }
  0x41   : > { %v667_v0 = vmov 0.0  }
  0x42   : > { %216 = vst [vmem:[#allocation2] sm:$0xf] %v667_v0  ;;  %217 = vst [vmem:[#allocation2 + $0x4] sm:$0xf] %v667_v0 }
  0x43 PF: > { %v218_v1 = vld [vmem:[%s189_s9] sm:$0xf]  ;;  %v219_v3 = vld [vmem:[%s189_s9 + $0x4] sm:$0xf]  ;;  %p430_p4 = scmp.ne.s32.totalorder %s652_s15, 1 }
  0x48   : > { %229 = sbr.rel (%p430_p4) target bundleno = 426 (0x1aa), region = 48 }
  0x49   : > { %v220_v2 = vld [vmem:[#allocation2] sm:$0xf]  ;;  %v221_v5 = vld [vmem:[#allocation2 + $0x4] sm:$0xf] }
  0x4a   : > { %v222_v4 = vadd.f32 %v220_v2, %v218_v1  ;;  %v223_v6 = vadd.f32 %v221_v5, %v219_v3 }
  0x4c   : > { %224 = vst [vmem:[#allocation2] sm:$0xf] %v222_v4  ;;  %225 = vst [vmem:[#allocation2 + $0x4] sm:$0xf] %v223_v6 }
  0x4d   : > { %vm232_vm0 = vcmask 1043456   ;;  %v239_v11 = vld [vmem:[#allocation6] sm:$0xf]  ;;  %v668_v12 = vmov 0.0   ;;  %vm669_vm1 = vmmov 0   ;;  %v249_v13 = vlaneseq }
  0x4e   : > { %440 = vmatprep.subr.mxu0 %v668_v12  ;;  %442 = vmatprep.mubr.msk.f32.mxu0 %vm669_vm1, %v668_v12  ;;  %vm259_vm2 = vcmask 1041409   ;;  %vm261_vm3 = vcmask 31744   ;;  %v431_v22 = vld [vmem:[%s827_s2] ss:$0 sm:$0xff] }
  0x4f   : > { %441 = vmatpush3.msk.msra.mxu0 %vm232_vm0, %v239_v11  ;;  %v250_v14 = vand.u32 127, %v249_v13  ;;  %v252_v15 = vshrl.u32 %v249_v13, 7 }
  0x51   : > { %v253_v17 = vsub.s32 %v250_v14, %v252_v15 }
  0x53   : > { %v230_v7 = vld [vmem:[#allocation2] sm:$0xf]  ;;  %v231_v8 = vld [vmem:[#allocation2 + $0x4] sm:$0xf] }
  0x54   : > { %v233_v9 = vsel %vm232_vm0, %v230_v7, 0.0  ;;  %v236_v10 = vsel %vm232_vm0, %v231_v8, 0.0 }
  0x55   : > { %234 = vadd.xlane.f32.xlu0 %v233_v9 }
  0x59   : > { %237 = vadd.xlane.f32.xlu0 %v236_v10 }
  0xde   : > { %v235_v16 = vpop.xlane.xlu0 %234 }
  0xdf   : > { %v254_v19 = vrot.slane %v235_v16, %v253_v17 }
  0xe2   : > { %v238_v18 = vpop.xlane.xlu0 %237 }
  0xe3   : > { %v258_v20 = vrot.slane %v238_v18, %v253_v17 }
  0xe5   : > { %v260_v21 = vsel %vm259_vm2, %v258_v20, %v254_v19 }
  0xe6   : > { %443 = vmatmul.mubr.msk.f32.vlgmr.msra.gmra.mxu0 %vm261_vm3, %v260_v21 }
 0x1a6   : > { %v333_v23 = vpop.f32.mrf.mxu0 }
 0x1a7   : > { %v334_v24 = vadd.f32 %v431_v22, %v333_v23 }
 0x1a8   : > { %v444_v25 = vpop.f32.mrf.mxu0 }
 0x1a9   : > { %337 = vst [vmem:[#allocation8] sm:$0x3] %v334_v24 }
 0x1aa PF: > { %p792_p3 = scmp.eq.s32.totalorder %s420_s18, 1  ;;  %s670_s22 = smov [#allocation8]  }
 0x1ab   : > { %s347_s26 = sshll.u32 %s670_s22, 4  ;;  %s348_s26 = int_to_ptr.vmem [resolvable:$true] %s347_s26 }
 0x1ac   : > { %s578_s7 = scalar_lea.vmem %s348_s26, 32  ;;  %p585_p10 = scmp.lt.s32.totalorder %s348_s26, %s348_s26 }
 0x1ad   : > { %p579_p6 = scmp.ne.s32.totalorder %s348_s26, %s578_s7  ;;  %p586_p11 = scmp.lt.s32.totalorder %s578_s7, %s578_s7 }
 0x1af   : > { %p580_p8 = pnand %p579_p6, %p792_p3  ;;  %p587_p13 = por %p586_p11, %p585_p10 }
 0x1b1   : > { %p581_p9 = pneg %p580_p8 }
 0x1b3   : > { %p588_p0 = pnand %p587_p13, %p581_p9 }
 0x1b5   : > { %591 = shalt.err (!%p588_p0)
}
 0x1b6   : > { %452 = dma.vmem_to_hbm [thread:$0]  (%p792_p3), %s348_s26, 32, %s828_s3, [#allocation5]  }
 0x1b7   : > { %635 = dma.done.wait (%p792_p3), [#allocation5], 32  }
 0x1b8   : > { %637 = vsyncadd (%p792_p3), [#allocation5], 4294967264 }
 0x1b9 PF: > { %s18_s17 = sadd.s32 1, %s660_s17   ;;  %s838_s11 = smov %s768_s12 }
 0x1ba   : > { %p15_p1 = scmp.ge.s32.totalorder %s18_s17, 4   ;;  %s839_s12 = smov %s644_s13 }
 0x1bb   : > { %s840_s13 = smov %s648_s14  ;;  %s841_s14 = smov %s838_s11 }
 0x1bc   : > { %s842_s15 = smov %s656_s16  ;;  %s843_s16 = smov %s845_s30 }
 0x1bd   :  { %17 = sbr.rel (!%p15_p1) target bundleno = 6 (0x6), region = 82 }
 0x1c2   :  { %360 = vsyncpa [#allocation4], 1 }
 0x1c3   :  { %362 = vsyncpa [#allocation4 + $0x1], 1 }
 0x1c4   :  { %363 = vsyncpa [#allocation7], 1 }
 0x1c5   :  { %364 = vsyncpa [#allocation5], 1 }
 0x1c6   :  { %366 = vsyncpa [#allocation5 + $0x1], 1 }

</bundles_post_ra>
